<compile_context>
chip_gen: v5e
topology: v5e:2x2
jax: 0.10.0
libtpu: 0.0.40
codegen_flags: <defaults>
</compile_context>

<pallas_src>
import functools
import math

import jax
import jax.numpy as jnp
from jax import lax
from jax.experimental import pallas as pl
from jax.experimental.pallas import tpu as pltpu


# a @ b.T for 2-D operands: contract axis 1 of both (PyTorch Linear weight is (out, in)).
_CONTRACT_LAST = (((1,), (1,)), ((), ()))


def _round_up(a, b):
    return ((a + b - 1) // b) * b


def _pad_rows(a, n_pad):
    n = a.shape[0]
    if n_pad == n:
        return a
    return jnp.pad(a, ((0, n_pad - n), (0, 0)))


def _project(v_ref, w_ref, b_ref):
    # Linear(v) with PyTorch (out, in) weight layout, f32 math / f32 MXU accumulation.
    v = v_ref[...].astype(jnp.float32)
    w = w_ref[...].astype(jnp.float32)
    b = b_ref[...].astype(jnp.float32)
    return lax.dot_general(v, w, _CONTRACT_LAST,
                           preferred_element_type=jnp.float32) + b


def _matcher_pair_kernel(x_ref, y_ref, wl_ref, bl_ref, wr_ref, br_ref, o_ref,
                         *, inv_sqrt_hd):
    left = _project(x_ref, wl_ref, bl_ref)       # (tm, H) f32
    right = _project(y_ref, wr_ref, br_ref)      # (tm, H) f32
    prod = left * right                          # VPU
    # Row-wise reduction as a (1,H) x (tm,H)^T matmul: the MXU result is already
    # the lane-dense (1, tm) row we want to store (unmasked vst, tiny out tile).
    ones = jnp.ones((1, prod.shape[-1]), jnp.float32)
    o_ref[...] = lax.dot_general(ones, prod, _CONTRACT_LAST,
                                 preferred_element_type=jnp.float32) * inv_sqrt_hd


def _matcher_full_kernel(x_ref, y_ref, wl_ref, bl_ref, wr_ref, br_ref, o_ref,
                         left_ref, *, inv_sqrt_hd):
    # 'left' depends only on grid axis i: compute it once per i (j == 0) and keep
    # it in VMEM scratch across the j sweep (j axis is "arbitrary", see wrapper).
    @pl.when(pl.program_id(1) == 0)
    def _():
        left_ref[...] = _project(x_ref, wl_ref, bl_ref)
    right = _project(y_ref, wr_ref, br_ref)      # (tn, H) f32
    # TODO(synk): on v7x a bf16 cast of left/right here doubles MXU throughput
    # for this K=32 matmul but changes numerics slightly; kept f32 for all gens.
    o_ref[...] = lax.dot_general(left_ref[...], right, _CONTRACT_LAST,
                                 preferred_element_type=jnp.float32) * inv_sqrt_hd


def matcher(x, y, wl, bl, wr, br, pair=True,
            tm_pair=4096, tm_full=1024, tn_full=1024):
    """x: (N, H), y: (M, H); wl/wr: (H, H) PyTorch (out,in) layout; bl/br: (H,)."""
    N, H = x.shape
    M = y.shape[0]
    inv_sqrt_hd = 1.0 / math.sqrt(H)
    bl2 = bl.reshape(1, H)
    br2 = br.reshape(1, H)

    # Weights / biases stay VMEM-resident (constant block index) across the grid.
    w_spec = pl.BlockSpec((H, H), lambda *_: (0, 0))
    b_spec = pl.BlockSpec((1, H), lambda *_: (0, 0))
    vmem_limit = 32 * 1024 * 1024   # covers 1024x1024 f32 tiles; raises v5e default.

    if pair:
        assert N == M, "pair=True requires x and y with the same number of rows"
        # Row tile: big (amortise ~0.35us/step overhead) and lane/sublane legal.
        if N <= 128:
            tm = _round_up(N, 8)                       # single full-axis block
        else:
            tm = min(tm_pair, _round_up(N, 128))       # multiple of 128 (lane axis of out)
            if _round_up(N, tm) // tm < 2 and N >= 256:
                # keep >= 2 programs so v7x's two TensorCores both get work
                tm = _round_up((N + 1) // 2, 128)
        n_pad = _round_up(N, tm)
        xp = _pad_rows(x, n_pad)
        yp = _pad_rows(y, n_pad)
        out = pl.pallas_call(
            functools.partial(_matcher_pair_kernel, inv_sqrt_hd=inv_sqrt_hd),
            out_shape=jax.ShapeDtypeStruct((1, n_pad), jnp.float32),
            grid=(n_pad // tm,),
            in_specs=[
                pl.BlockSpec((tm, H), lambda i: (i, 0)),   # x row tile
                pl.BlockSpec((tm, H), lambda i: (i, 0)),   # y row tile
                w_spec, b_spec,                            # left linear
                w_spec, b_spec,                            # right linear
            ],
            out_specs=pl.BlockSpec((1, tm), lambda i: (0, i)),   # lane-dense row
            compiler_params=pltpu.CompilerParams(
                dimension_semantics=("parallel",),
                vmem_limit_bytes=vmem_limit),
        )(xp, yp, wl, bl2, wr, br2)
        return out[0, :N]                                  # -> (N,)

    # full score matrix path
    tm = min(tm_full, _round_up(N, 8))
    n_pad = _round_up(N, tm)
    if M <= 128:
        tn = M                                             # full-axis block, legal
        m_pad = M
    else:
        tn = min(tn_full, _round_up(M, 128))
        m_pad = _round_up(M, tn)
    xp = _pad_rows(x, n_pad)
    yp = _pad_rows(y, m_pad)
    out = pl.pallas_call(
        functools.partial(_matcher_full_kernel, inv_sqrt_hd=inv_sqrt_hd),
        out_shape=jax.ShapeDtypeStruct((n_pad, m_pad), jnp.float32),
        grid=(n_pad // tm, m_pad // tn),
        in_specs=[
            pl.BlockSpec((tm, H), lambda i, j: (i, 0)),    # x row tile
            pl.BlockSpec((tn, H), lambda i, j: (j, 0)),    # y row tile
            w_spec, b_spec,
            w_spec, b_spec,
        ],
        out_specs=pl.BlockSpec((tm, tn), lambda i, j: (i, j)),
        scratch_shapes=[pltpu.VMEM((tm, H), jnp.float32)],  # cached 'left' projection
        compiler_params=pltpu.CompilerParams(
            # j must be "arbitrary": the left-projection cache relies on j == 0
            # being visited first for every i on each core (i stays "parallel"
            # so v7x can shard rows across its two TensorCores).
            dimension_semantics=("parallel", "arbitrary"),
            vmem_limit_bytes=vmem_limit),
    )(xp, yp, wl, bl2, wr, br2)
    return out[:N, :M]                                     # -> (N, M)


def build_params(n_hid, key):
    # nn.Linear(n_hid, n_hid) x 2: uniform(-1/sqrt(H), 1/sqrt(H)) init (PyTorch-style).
    bound = 1.0 / math.sqrt(n_hid)
    k_wl, k_bl, k_wr, k_br = jax.random.split(key, 4)
    wl = jax.random.uniform(k_wl, (n_hid, n_hid), jnp.float32, -bound, bound)
    bl = jax.random.uniform(k_bl, (n_hid,), jnp.float32, -bound, bound)
    wr = jax.random.uniform(k_wr, (n_hid, n_hid), jnp.float32, -bound, bound)
    br = jax.random.uniform(k_br, (n_hid,), jnp.float32, -bound, bound)
    return wl, bl, wr, br


if __name__ == "__main__":
    n_hid = 32
    N = 8   # number of left nodes
    M = 8   # number of right nodes (== N so the pair path is well-defined)

    key = jax.random.PRNGKey(0)
    k_x, k_y, k_p = jax.random.split(key, 3)
    x = jax.random.normal(k_x, (N, n_hid), dtype=jnp.float32)
    y = jax.random.normal(k_y, (M, n_hid), dtype=jnp.float32)
    wl, bl, wr, br = build_params(n_hid, k_p)

    out_pair = jax.block_until_ready(matcher(x, y, wl, bl, wr, br, pair=True))
    out_full = jax.block_until_ready(matcher(x, y, wl, bl, wr, br, pair=False))

    # Pure-JAX reference (matches the PyTorch forward).
    left = x @ wl.T + bl
    right = y @ wr.T + br
    sqrt_hd = jnp.sqrt(jnp.float32(n_hid))
    ref_pair = (left * right).sum(axis=-1) / sqrt_hd
    ref_full = (left @ right.T) / sqrt_hd

    assert out_pair.shape == (N,)
    assert out_full.shape == (N, M)
    assert jnp.allclose(out_pair, ref_pair, atol=1e-5, rtol=1e-5), "pair path mismatch"
    assert jnp.allclose(out_full, ref_full, atol=1e-5, rtol=1e-5), "full path mismatch"

    print("KERNEL_OK")
</pallas_src>

<mosaic_0001>
module attributes {stable_mosaic.version = 11 : i64} {
  func.func @_matcher_pair_kernel(%arg0: i32, %arg1: memref<8x32xf32, #tpu.memory_space<vmem>>, %arg2: memref<8x32xf32, #tpu.memory_space<vmem>>, %arg3: memref<32x32xf32, #tpu.memory_space<vmem>>, %arg4: memref<1x32xf32, #tpu.memory_space<vmem>>, %arg5: memref<32x32xf32, #tpu.memory_space<vmem>>, %arg6: memref<1x32xf32, #tpu.memory_space<vmem>>, %arg7: memref<1x8xf32, #tpu.memory_space<vmem>>) attributes {dimension_semantics = [#tpu.dimension_semantics<parallel>], iteration_bounds = array<i64: 1>, scalar_prefetch = 0 : i64, scratch_operands = 0 : i64, tpu.core_type = #tpu.core_type<tc>, window_params = [{transform_indices = @transform_0, window_bounds = array<i64: 8, 32>}, {transform_indices = @transform_1, window_bounds = array<i64: 8, 32>}, {pipeline_mode = #tpu.pipeline_mode<synchronous>, transform_indices = @transform_2, window_bounds = array<i64: 32, 32>}, {pipeline_mode = #tpu.pipeline_mode<synchronous>, transform_indices = @transform_3, window_bounds = array<i64: 1, 32>}, {pipeline_mode = #tpu.pipeline_mode<synchronous>, transform_indices = @transform_4, window_bounds = array<i64: 32, 32>}, {pipeline_mode = #tpu.pipeline_mode<synchronous>, transform_indices = @transform_5, window_bounds = array<i64: 1, 32>}, {transform_indices = @transform_6, window_bounds = array<i64: 1, 8>}]} {
    %c0 = arith.constant 0 : index
    %c0_0 = arith.constant 0 : index
    %0 = vector.load %arg1[%c0, %c0_0] : memref<8x32xf32, #tpu.memory_space<vmem>>, vector<8x32xf32>
    %c0_1 = arith.constant 0 : index
    %c0_2 = arith.constant 0 : index
    %1 = vector.load %arg3[%c0_1, %c0_2] : memref<32x32xf32, #tpu.memory_space<vmem>>, vector<32x32xf32>
    %c0_3 = arith.constant 0 : index
    %c0_4 = arith.constant 0 : index
    %2 = vector.load %arg4[%c0_3, %c0_4] : memref<1x32xf32, #tpu.memory_space<vmem>>, vector<1x32xf32>
    %cst = arith.constant dense<0.000000e+00> : vector<8x32xf32>
    %3 = tpu.matmul %0, %1, %cst {dimension_numbers = #tpu.dot_dimension_numbers<[1], [1], [0], [0], [0, 0, 1, 0], [], []>} : vector<8x32xf32>, vector<32x32xf32>, vector<8x32xf32> -> vector<8x32xf32>
    %4 = vector.broadcast %2 : vector<1x32xf32> to vector<8x32xf32>
    %5 = arith.addf %3, %4 : vector<8x32xf32>
    %c0_5 = arith.constant 0 : index
    %c0_6 = arith.constant 0 : index
    %6 = vector.load %arg2[%c0_5, %c0_6] : memref<8x32xf32, #tpu.memory_space<vmem>>, vector<8x32xf32>
    %c0_7 = arith.constant 0 : index
    %c0_8 = arith.constant 0 : index
    %7 = vector.load %arg5[%c0_7, %c0_8] : memref<32x32xf32, #tpu.memory_space<vmem>>, vector<32x32xf32>
    %c0_9 = arith.constant 0 : index
    %c0_10 = arith.constant 0 : index
    %8 = vector.load %arg6[%c0_9, %c0_10] : memref<1x32xf32, #tpu.memory_space<vmem>>, vector<1x32xf32>
    %cst_11 = arith.constant dense<0.000000e+00> : vector<8x32xf32>
    %9 = tpu.matmul %6, %7, %cst_11 {dimension_numbers = #tpu.dot_dimension_numbers<[1], [1], [0], [0], [0, 0, 1, 0], [], []>} : vector<8x32xf32>, vector<32x32xf32>, vector<8x32xf32> -> vector<8x32xf32>
    %10 = vector.broadcast %8 : vector<1x32xf32> to vector<8x32xf32>
    %11 = arith.addf %9, %10 : vector<8x32xf32>
    %12 = arith.mulf %5, %11 : vector<8x32xf32>
    %cst_12 = arith.constant 1.000000e+00 : f32
    %13 = vector.broadcast %cst_12 : f32 to vector<1x32xf32>
    %cst_13 = arith.constant dense<0.000000e+00> : vector<1x8xf32>
    %14 = tpu.matmul %13, %12, %cst_13 {dimension_numbers = #tpu.dot_dimension_numbers<[1], [1], [0], [0], [0, 0, 1, 0], [], []>} : vector<1x32xf32>, vector<8x32xf32>, vector<1x8xf32> -> vector<1x8xf32>
    %cst_14 = arith.constant 0.176776692 : f32
    %15 = vector.broadcast %cst_14 : f32 to vector<1x8xf32>
    %16 = arith.mulf %14, %15 : vector<1x8xf32>
    %c0_15 = arith.constant 0 : index
    %c0_16 = arith.constant 0 : index
    %17 = vector.load %arg7[%c0_15, %c0_16] : memref<1x8xf32, #tpu.memory_space<vmem>>, vector<1x8xf32>
    tpu.vector_store %arg7[%c0_15, %c0_16], %16 {strides = array<i32>} : memref<1x8xf32, #tpu.memory_space<vmem>>, vector<1x8xf32>,
    return
  }
  func.func @transform_0(%arg0: i32) -> (i32, i32) {
    %c0_i32 = arith.constant 0 : i32
    %c0_i32_0 = arith.constant 0 : i32
    return %arg0, %c0_i32 : i32, i32
  }
  func.func @transform_1(%arg0: i32) -> (i32, i32) {
    %c0_i32 = arith.constant 0 : i32
    %c0_i32_0 = arith.constant 0 : i32
    return %arg0, %c0_i32 : i32, i32
  }
  func.func @transform_2(%arg0: i32) -> (i32, i32) {
    %c0_i32 = arith.constant 0 : i32
    %c0_i32_0 = arith.constant 0 : i32
    %c0_i32_1 = arith.constant 0 : i32
    return %c0_i32, %c0_i32_0 : i32, i32
  }
  func.func @transform_3(%arg0: i32) -> (i32, i32) {
    %c0_i32 = arith.constant 0 : i32
    %c0_i32_0 = arith.constant 0 : i32
    %c0_i32_1 = arith.constant 0 : i32
    return %c0_i32, %c0_i32_0 : i32, i32
  }
  func.func @transform_4(%arg0: i32) -> (i32, i32) {
    %c0_i32 = arith.constant 0 : i32
    %c0_i32_0 = arith.constant 0 : i32
    %c0_i32_1 = arith.constant 0 : i32
    return %c0_i32, %c0_i32_0 : i32, i32
  }
  func.func @transform_5(%arg0: i32) -> (i32, i32) {
    %c0_i32 = arith.constant 0 : i32
    %c0_i32_0 = arith.constant 0 : i32
    %c0_i32_1 = arith.constant 0 : i32
    return %c0_i32, %c0_i32_0 : i32, i32
  }
  func.func @transform_6(%arg0: i32) -> (i32, i32) {
    %c0_i32 = arith.constant 0 : i32
    %c0_i32_0 = arith.constant 0 : i32
    return %c0_i32, %arg0 : i32, i32
  }
}

</mosaic_0001>

<bundles_post_ra>
// kernel: tpu_custom_call.1
= control target key start
LH: loop header
LB: loop body
LE: loop exit
PB: predicated region body
PF: predicated region fallthrough
CT: control target
= control target key end

     0   :  { %11 = vsyncpa [#allocation3], 0  ;;  %s447_s0 = inlined_call_operand.hbm [shape: f32[8,32], index: 0, kind: input, shape index: {}]   ;;  %s448_s1 = inlined_call_operand.hbm [shape: f32[8,32], index: 1, kind: input, shape index: {}]   ;;  %s449_s2 = inlined_call_operand.hbm [shape: f32[32,32], index: 2, kind: input, shape index: {}]   ;;  %s450_s3 = inlined_call_operand.vmem [shape: f32[1,32], index: 3, kind: input, shape index: {}]   ;;  %s451_s4 = inlined_call_operand.hbm [shape: f32[32,32], index: 4, kind: input, shape index: {}]   ;;  %s452_s5 = inlined_call_operand.vmem [shape: f32[1,32], index: 5, kind: input, shape index: {}]   ;;  %s453_s6 = inlined_call_operand.hbm [shape: f32[1,8], index: 6, kind: output, shape index: {}]  }
   0x1   :  { %12 = vsyncpa [#allocation6], 0 }
   0x2   :  { %13 = vsyncpa [#allocation9], 0  ;;  %s31_s23 = sshll.u32 %s448_s1, 4  ;;  %s32_s23 = int_to_ptr.hbm [resolvable:$true] %s31_s23 }
   0x3   :  { %14 = vsyncpa [#allocation4], 0  ;;  %s371_s24 = smov [#allocation5]   ;;  %s20_s28 = sshll.u32 %s447_s0, 4  ;;  %s21_s28 = int_to_ptr.hbm [resolvable:$true] %s20_s28 }
   0x4   :  { %s33_s25 = sshll.u32 %s371_s24, 4  ;;  %s372_s29 = smov [#allocation2]   ;;  %s34_s25 = int_to_ptr.vmem [resolvable:$true] %s33_s25 }
   0x5   :  { %36 = dma.hbm_to_vmem [thread:$0]  %s32_s23, 128, %s34_s25, [#allocation6]  }
   0x6   :  { %s22_s30 = sshll.u32 %s372_s29, 4  ;;  %s41_s9 = sshll.u32 %s449_s2, 4  ;;  %s23_s30 = int_to_ptr.vmem [resolvable:$true] %s22_s30  ;;  %s42_s9 = int_to_ptr.hbm [resolvable:$true] %s41_s9 }
   0x7   :  { %25 = dma.hbm_to_vmem [thread:$0]  %s21_s28, 128, %s23_s30, [#allocation3]  }
   0x8   :  { %s373_s1 = smov [#allocation7]   ;;  %s56_s13 = sshll.u32 %s451_s4, 4  ;;  %s57_s13 = int_to_ptr.hbm [resolvable:$true] %s56_s13 }
   0x9   :  { %s43_s10 = sshll.u32 %s373_s1, 4  ;;  %s374_s14 = smov 128   ;;  %s44_s10 = int_to_ptr.vmem [resolvable:$true] %s43_s10 }
   0xa   :  { %s375_s0 = smov 8   ;;  %s376_s15 = smov [#allocation8]  }
   0xb   :  { %49 = dma.hbm_to_vmem [thread:$0]  %s42_s9, 512, %s44_s10, [#allocation6], %s374_s14, %s374_s14, %s375_s0  }
   0xc   :  { %s58_s16 = sshll.u32 %s376_s15, 4  ;;  %s59_s16 = int_to_ptr.vmem [resolvable:$true] %s58_s16 }
   0xd   :  { %64 = dma.hbm_to_vmem [thread:$0]  %s57_s13, 512, %s59_s16, [#allocation9], %s374_s14, %s374_s14, %s375_s0  }
   0xe   :  { %363 = dma.done.wait [#allocation3], 128  }
   0xf   :  { %364 = vsyncadd [#allocation3], 4294967168 }
  0x10   :  { %365 = dma.done.wait [#allocation6], 640  }
  0x11   :  { %366 = vsyncadd [#allocation6], 4294966656 }
  0x12   :  { %367 = dma.done.wait [#allocation9], 512  }
  0x13   :  { %368 = vsyncadd [#allocation9], 4294966784  ;;  %vm92_vm0 = vcmask 261120   ;;  %v87_v0 = vld [vmem:[#allocation7 + $0x18] sm:$0xff]  ;;  %v86_v2 = vld [vmem:[#allocation7 + $0x10] sm:$0xff]  ;;  %v377_v17 = vmov 1.0  }
  0x14   :  { %v132_v1 = vld [vmem:[#allocation8 + $0x18] sm:$0xff]  ;;  %221 = vmatpush.xpose.msk.msra.mxu0 %vm92_vm0, %v87_v0  ;;  %v131_v3 = vld [vmem:[#allocation8 + $0x10] sm:$0xff]  ;;  %v85_v4 = vld [vmem:[#allocation7 + $0x8] sm:$0xff]  ;;  %s378_s19 = smov [#allocation10]   ;;  %vm200_vm1 = vcmask 57344  }
  0x15   :  { %226 = vmatpush.xpose.msk.msra.mxu1 %vm92_vm0, %v132_v1  ;;  %v130_v5 = vld [vmem:[#allocation8 + $0x8] sm:$0xff]  ;;  %v84_v6 = vld [vmem:[#allocation7] sm:$0xff]  ;;  %v83_v8 = vld [vmem:[#allocation2] sm:$0xff]  ;;  %s207_s20 = sshll.u32 %s378_s19, 4  ;;  %s208_s20 = int_to_ptr.vmem [resolvable:$true] %s207_s20 }
  0x16   :  { %v129_v7 = vld [vmem:[#allocation8] sm:$0xff]  ;;  %v128_v9 = vld [vmem:[#allocation5] sm:$0xff]  ;;  %v241_v10 = vld [vmem:[%s450_s3] ss:$0 sm:$0xff]  ;;  %s209_s3 = sshll.u32 %s453_s6, 4  ;;  %s210_s3 = int_to_ptr.hbm [resolvable:$true] %s209_s3 }
  0x17   :  { %v242_v11 = vld [vmem:[%s452_s5] ss:$0 sm:$0xff] }
  0x18   :  { %222 = vmatpush.xpose.msk.msra.mxu0 %vm92_vm0, %v86_v2 }
  0x19   :  { %227 = vmatpush.xpose.msk.msra.mxu1 %vm92_vm0, %v131_v3 }
  0x1c   :  { %223 = vmatpush.xpose.msk.msra.mxu0 %vm92_vm0, %v85_v4 }
  0x1d   :  { %228 = vmatpush.xpose.msk.msra.mxu1 %vm92_vm0, %v130_v5 }
  0x20   :  { %224 = vmatpush.xpose.msk.msra.mxu0 %vm92_vm0, %v84_v6 }
  0x21   :  { %229 = vmatpush.xpose.msk.msra.mxu1 %vm92_vm0, %v129_v7 }
  0x23   :  { %225 = vmatmul.msk.f32.vlgmr.msra.gmra.mxu0 %vm92_vm0, %v83_v8 }
  0x24   :  { %230 = vmatmul.msk.f32.vlgmr.msra.gmra.mxu1 %vm92_vm0, %v128_v9 }
  0xa0   :  { %v125_v12 = vpop.f32.mrf.mxu0 }
  0xa1   :  { %v169_v13 = vpop.f32.mrf.mxu1  ;;  %v126_v14 = vadd.f32 %v241_v10, %v125_v12 }
  0xa2   :  { %v170_v15 = vadd.f32 %v242_v11, %v169_v13 }
  0xa4   :  { %v172_v16 = vmul.f32 %v170_v15, %v126_v14 }
  0xa6   :  { %231 = vmatpush.xpose.msk.msra.mxu2 %vm92_vm0, %v172_v16 }
  0xa9   :  { %232 = vmatmul.msk.f32.vlgmr.msra.gmra.mxu2 %vm92_vm0, %v377_v17 }
 0x12c   :  { %v196_v18 = vpop.f32.mrf.mxu2 }
 0x12d   :  { %v199_v19 = vmul.f32 0.17677669, %v196_v18 }
 0x12f   :  { %201 = vst.msk [vmem:[#allocation10] sm:$0x1] %vm200_vm1, %v199_v19 }
 0x130   :  { %212 = dma.vmem_to_hbm [thread:$0]  %s208_s20, 16, %s210_s3, [#allocation4]  }
 0x131   :  { %369 = dma.done.wait [#allocation4], 16  }
 0x132   :  { %370 = vsyncadd [#allocation4], 4294967280 }
 0x133   :  { %217 = vsyncpa [#allocation3], 1 }
 0x134   :  { %218 = vsyncpa [#allocation6], 1 }
 0x135   :  { %219 = vsyncpa [#allocation9], 1 }
 0x136   :  { %220 = vsyncpa [#allocation4], 1 }

</bundles_post_ra>
